<compile_context>
chip_gen: v7x
topology: tpu7x:2x2x1
jax: 0.10.0
libtpu: 0.0.40
codegen_flags: <defaults>
</compile_context>

<pallas_src>
from functools import partial

import jax
import jax.numpy as jnp
from jax.experimental import pallas as pl
from jax.experimental.pallas import tpu as pltpu

LANE = 128                   # padded feature width for the hidden/output layers
W2_OFF = 0                   # row offsets inside the bf16 weight slab
W3_OFF = LANE
BIAS_OFF = 2 * LANE          # row 0 = b2, row 1 = b3
SLAB_ROWS = 2 * LANE + 16    # 272 rows, multiple of 16 (bf16 sublane tile)


def _cdiv(a, b):
    return -(-a // b)


def _round_up(n, m):
    return _cdiv(n, m) * m


def dqn_kernel(x_ref, w1b1_ref, slab_ref, o_ref):
    # ---- layer 1 (exact f32, tiny K = in_states): h1 = tanh(x @ W1 + b1) ----
    in_states = x_ref.shape[1]                   # static Python int
    rows_w1 = w1b1_ref.shape[0] - 8              # bias row offset (static)
    w1b1 = w1b1_ref[...]                         # (rows_w1 + 8, 128) f32
    w1 = w1b1[:in_states, :]                     # (in, 128)
    b1 = w1b1[rows_w1:rows_w1 + 1, :]            # (1, 128)

    x = x_ref[...]                               # (tile_b, in) f32
    h1 = jnp.tanh(jnp.dot(x, w1, preferred_element_type=jnp.float32) + b1)

    # ---- layers 2/3: bf16 weights & activations, f32 accumulation on the MXU ----
    w2 = slab_ref[pl.ds(W2_OFF, LANE), :]        # (128, 128) bf16
    w3 = slab_ref[pl.ds(W3_OFF, LANE), :]        # (128, 128) bf16
    bias = slab_ref[pl.ds(BIAS_OFF, 16), :]      # (16, 128) bf16
    b2 = bias[0:1, :].astype(jnp.float32)
    b3 = bias[1:2, :].astype(jnp.float32)

    h2 = jnp.tanh(
        jnp.dot(h1.astype(jnp.bfloat16), w2, preferred_element_type=jnp.float32) + b2
    )
    # Lane-dense (tile_b, 128) output block -> unmasked vector stores.
    o_ref[...] = (
        jnp.dot(h2.astype(jnp.bfloat16), w3, preferred_element_type=jnp.float32) + b3
    ).astype(o_ref.dtype)


def pack_params(params):
    """Pack (w1,b1,w2,b2,w3,b3) once into (w1b1_f32, slab_bf16).

    Call this once at init and again whenever the weights are updated; the packed
    arrays are what the jitted forward consumes (no per-inference packing cost).
    """
    w1, b1, w2, b2, w3, b3 = params
    in_states, h1_nodes = w1.shape
    h2_nodes = w2.shape[1]
    out_actions = w3.shape[1]
    assert h1_nodes <= LANE and h2_nodes <= LANE and out_actions <= LANE

    # Layer-1 block stays f32 (exact first layer; it is tiny).
    rows_w1 = max(8, _round_up(in_states, 8))
    w1b1 = jnp.zeros((rows_w1 + 8, LANE), jnp.float32)
    w1b1 = w1b1.at[:in_states, :h1_nodes].set(w1.astype(jnp.float32))
    w1b1 = w1b1.at[rows_w1, :h1_nodes].set(b1.reshape(-1).astype(jnp.float32))

    def pad_w(w):
        return jnp.pad(
            w.astype(jnp.float32),
            ((0, LANE - w.shape[0]), (0, LANE - w.shape[1])),
        )

    bias_blk = jnp.zeros((16, LANE), jnp.float32)
    bias_blk = bias_blk.at[0, :h2_nodes].set(b2.reshape(-1).astype(jnp.float32))
    bias_blk = bias_blk.at[1, :out_actions].set(b3.reshape(-1).astype(jnp.float32))

    slab = jnp.concatenate([pad_w(w2), pad_w(w3), bias_blk], axis=0).astype(jnp.bfloat16)
    assert slab.shape == (SLAB_ROWS, LANE)
    return w1b1, slab


@partial(jax.jit, static_argnames=("out_actions",))
def dqn_forward_packed(x, w1b1, slab, *, out_actions):
    x = x.astype(jnp.float32)
    B, in_states = x.shape

    # Batch tile: big tiles amortize the ~0.35 us per-grid-step overhead; large
    # batches keep >= 2 grid steps so the "parallel" axis shards across 2 TCs (v7x).
    if B <= 512:
        tile_b = max(16, _round_up(B, 16))
    else:
        tile_b = min(1024, _round_up(_cdiv(B, 2), 16))
    b_pad = _round_up(B, tile_b)

    if b_pad != B:
        x = jnp.pad(x, ((0, b_pad - B), (0, 0)))   # batch pad only; no lane padding

    out = pl.pallas_call(
        dqn_kernel,
        out_shape=jax.ShapeDtypeStruct((b_pad, LANE), jnp.float32),
        grid=(b_pad // tile_b,),
        in_specs=[
            # x: batch-tiled at its natural width, double-buffered by the pipeline.
            pl.BlockSpec((tile_b, in_states), lambda i: (i, 0)),
            # packed params: constant index -> fetched once, VMEM-resident.
            pl.BlockSpec(w1b1.shape, lambda i: (0, 0)),
            pl.BlockSpec(slab.shape, lambda i: (0, 0)),
        ],
        out_specs=pl.BlockSpec((tile_b, LANE), lambda i: (i, 0)),
        compiler_params=pltpu.CompilerParams(
            dimension_semantics=("parallel",),
        ),
    )(x, w1b1, slab)

    return out[:B, :out_actions]


def dqn_forward(x, params):
    """Convenience wrapper (re-packs every call). Prefer pack_params + dqn_forward_packed."""
    out_actions = params[4].shape[1]
    w1b1, slab = pack_params(params)
    return dqn_forward_packed(x, w1b1, slab, out_actions=out_actions)


def init_params(key, in_states, h1_nodes, out_actions):
    """Deterministic init mimicking nn.Linear default: U(-1/sqrt(fan_in), 1/sqrt(fan_in))."""
    ks = jax.random.split(key, 6)
    h2_nodes = h1_nodes * 2

    def linear(kw, kb, fan_in, fan_out):
        bound = 1.0 / jnp.sqrt(fan_in)
        w = jax.random.uniform(kw, (fan_in, fan_out), jnp.float32, -bound, bound)
        b = jax.random.uniform(kb, (1, fan_out), jnp.float32, -bound, bound)
        return w, b

    w1, b1 = linear(ks[0], ks[1], in_states, h1_nodes)
    w2, b2 = linear(ks[2], ks[3], h1_nodes, h2_nodes)
    w3, b3 = linear(ks[4], ks[5], h2_nodes, out_actions)
    return w1, b1, w2, b2, w3, b3


def _reference(x, params):
    w1, b1, w2, b2, w3, b3 = params
    h = jnp.tanh(x @ w1 + b1)
    h = jnp.tanh(h @ w2 + b2)
    return h @ w3 + b3


if __name__ == "__main__":
    in_states, h1_nodes, out_actions = 8, 32, 4

    key = jax.random.PRNGKey(0)
    kx, kp, kx2, kx3 = jax.random.split(key, 4)
    params = init_params(kp, in_states, h1_nodes, out_actions)

    # Pack once (done again only when weights change during training).
    w1b1, slab = pack_params(params)

    # bf16 weights/activations in layers 2/3 -> loosen tolerance vs. f32 reference.
    TOL = 5e-2

    # Small batch (matches the module's typical single/tiny-batch use).
    batch = 2
    x = jax.random.normal(kx, (batch, in_states), jnp.float32)
    out = dqn_forward_packed(x, w1b1, slab, out_actions=out_actions)
    jax.block_until_ready(out)
    assert out.shape == (batch, out_actions)
    assert jnp.allclose(out, _reference(x, params), atol=TOL), "mismatch (small batch)"

    # Medium, non-multiple-of-tile batch: exercises batch padding.
    batch2 = 300
    x2 = jax.random.normal(kx2, (batch2, in_states), jnp.float32)
    out2 = dqn_forward_packed(x2, w1b1, slab, out_actions=out_actions)
    jax.block_until_ready(out2)
    assert out2.shape == (batch2, out_actions)
    assert jnp.allclose(out2, _reference(x2, params), atol=TOL), "mismatch (batched)"

    # Larger batch: exercises a multi-step grid with the weight blocks held resident.
    batch3 = 1200
    x3 = jax.random.normal(kx3, (batch3, in_states), jnp.float32)
    out3 = dqn_forward_packed(x3, w1b1, slab, out_actions=out_actions)
    jax.block_until_ready(out3)
    assert out3.shape == (batch3, out_actions)
    assert jnp.allclose(out3, _reference(x3, params), atol=TOL), "mismatch (large batch)"

    print("KERNEL_OK")
</pallas_src>

<mosaic_0001>
module attributes {stable_mosaic.version = 11 : i64} {
  func.func @dqn_kernel(%arg0: i32, %arg1: memref<16x8xf32, #tpu.memory_space<vmem>>, %arg2: memref<16x128xf32, #tpu.memory_space<vmem>>, %arg3: memref<272x128xbf16, #tpu.memory_space<vmem>>, %arg4: memref<16x128xf32, #tpu.memory_space<vmem>>) attributes {dimension_semantics = [#tpu.dimension_semantics<parallel>], iteration_bounds = array<i64: 1>, scalar_prefetch = 0 : i64, scratch_operands = 0 : i64, tpu.core_type = #tpu.core_type<tc>, window_params = [{transform_indices = @transform_0, window_bounds = array<i64: 16, 8>}, {pipeline_mode = #tpu.pipeline_mode<synchronous>, transform_indices = @transform_1, window_bounds = array<i64: 16, 128>}, {pipeline_mode = #tpu.pipeline_mode<synchronous>, transform_indices = @transform_2, window_bounds = array<i64: 272, 128>}, {transform_indices = @transform_3, window_bounds = array<i64: 16, 128>}]} {
    %c0 = arith.constant 0 : index
    %c0_0 = arith.constant 0 : index
    %0 = vector.load %arg2[%c0, %c0_0] : memref<16x128xf32, #tpu.memory_space<vmem>>, vector<16x128xf32>
    %1 = vector.extract_strided_slice %0 {offsets = [0, 0], sizes = [8, 128], strides = [1, 1]} : vector<16x128xf32> to vector<8x128xf32>
    %2 = vector.extract_strided_slice %0 {offsets = [8, 0], sizes = [1, 128], strides = [1, 1]} : vector<16x128xf32> to vector<1x128xf32>
    %c0_1 = arith.constant 0 : index
    %c0_2 = arith.constant 0 : index
    %3 = vector.load %arg1[%c0_1, %c0_2] : memref<16x8xf32, #tpu.memory_space<vmem>>, vector<16x8xf32>
    %cst = arith.constant dense<0.000000e+00> : vector<16x128xf32>
    %4 = tpu.matmul %3, %1, %cst {dimension_numbers = #tpu.dot_dimension_numbers<[1], [0], [0], [1], [0, 0, 1, 1], [], []>} : vector<16x8xf32>, vector<8x128xf32>, vector<16x128xf32> -> vector<16x128xf32>
    %5 = vector.broadcast %2 : vector<1x128xf32> to vector<16x128xf32>
    %6 = arith.addf %4, %5 : vector<16x128xf32>
    %7 = math.tanh %6 : vector<16x128xf32>
    %c0_3 = arith.constant 0 : index
    %c0_4 = arith.constant 0 : index
    %8 = vector.load %arg3[%c0_3, %c0_4] : memref<272x128xbf16, #tpu.memory_space<vmem>>, vector<128x128xbf16>
    %c128 = arith.constant 128 : index
    %c0_5 = arith.constant 0 : index
    %9 = vector.load %arg3[%c128, %c0_5] : memref<272x128xbf16, #tpu.memory_space<vmem>>, vector<128x128xbf16>
    %c256 = arith.constant 256 : index
    %c0_6 = arith.constant 0 : index
    %10 = vector.load %arg3[%c256, %c0_6] : memref<272x128xbf16, #tpu.memory_space<vmem>>, vector<16x128xbf16>
    %11 = vector.extract_strided_slice %10 {offsets = [0, 0], sizes = [1, 128], strides = [1, 1]} : vector<16x128xbf16> to vector<1x128xbf16>
    %12 = arith.extf %11 : vector<1x128xbf16> to vector<1x128xf32>
    %13 = vector.extract_strided_slice %10 {offsets = [1, 0], sizes = [1, 128], strides = [1, 1]} : vector<16x128xbf16> to vector<1x128xbf16>
    %14 = arith.extf %13 : vector<1x128xbf16> to vector<1x128xf32>
    %15 = arith.truncf %7 : vector<16x128xf32> to vector<16x128xbf16>
    %cst_7 = arith.constant dense<0.000000e+00> : vector<16x128xf32>
    %16 = tpu.matmul %15, %8, %cst_7 {dimension_numbers = #tpu.dot_dimension_numbers<[1], [0], [0], [1], [0, 0, 1, 1], [], []>} : vector<16x128xbf16>, vector<128x128xbf16>, vector<16x128xf32> -> vector<16x128xf32>
    %17 = vector.broadcast %12 : vector<1x128xf32> to vector<16x128xf32>
    %18 = arith.addf %16, %17 : vector<16x128xf32>
    %19 = math.tanh %18 : vector<16x128xf32>
    %20 = arith.truncf %19 : vector<16x128xf32> to vector<16x128xbf16>
    %cst_8 = arith.constant dense<0.000000e+00> : vector<16x128xf32>
    %21 = tpu.matmul %20, %9, %cst_8 {dimension_numbers = #tpu.dot_dimension_numbers<[1], [0], [0], [1], [0, 0, 1, 1], [], []>} : vector<16x128xbf16>, vector<128x128xbf16>, vector<16x128xf32> -> vector<16x128xf32>
    %22 = vector.broadcast %14 : vector<1x128xf32> to vector<16x128xf32>
    %23 = arith.addf %21, %22 : vector<16x128xf32>
    %c0_9 = arith.constant 0 : index
    %c0_10 = arith.constant 0 : index
    %24 = vector.load %arg4[%c0_9, %c0_10] : memref<16x128xf32, #tpu.memory_space<vmem>>, vector<16x128xf32>
    tpu.vector_store %arg4[%c0_9, %c0_10], %23 {strides = array<i32>} : memref<16x128xf32, #tpu.memory_space<vmem>>, vector<16x128xf32>,
    return
  }
  func.func @transform_0(%arg0: i32) -> (i32, i32) {
    %c0_i32 = arith.constant 0 : i32
    %c0_i32_0 = arith.constant 0 : i32
    return %arg0, %c0_i32 : i32, i32
  }
  func.func @transform_1(%arg0: i32) -> (i32, i32) {
    %c0_i32 = arith.constant 0 : i32
    %c0_i32_0 = arith.constant 0 : i32
    %c0_i32_1 = arith.constant 0 : i32
    return %c0_i32, %c0_i32_0 : i32, i32
  }
  func.func @transform_2(%arg0: i32) -> (i32, i32) {
    %c0_i32 = arith.constant 0 : i32
    %c0_i32_0 = arith.constant 0 : i32
    %c0_i32_1 = arith.constant 0 : i32
    return %c0_i32, %c0_i32_0 : i32, i32
  }
  func.func @transform_3(%arg0: i32) -> (i32, i32) {
    %c0_i32 = arith.constant 0 : i32
    %c0_i32_0 = arith.constant 0 : i32
    return %arg0, %c0_i32 : i32, i32
  }
}

</mosaic_0001>

<bundles_post_ra>
// kernel: dqn_forward_packed.1
= control target key start
LH: loop header
LB: loop body
LE: loop exit
PB: predicated region body
PF: predicated region fallthrough
CT: control target
= control target key end

     0   :  { %8 = vsyncpa [#allocation3], 0  ;;  %s489_s12 = smov [#allocation2]   ;;  %s562_s0 = inlined_call_operand.vmem [shape: f32[16,8], index: 0, kind: input, shape index: {}]   ;;  %s563_s1 = inlined_call_operand.vmem [shape: f32[16,128], index: 1, kind: input, shape index: {}]   ;;  %s564_s2 = inlined_call_operand.hbm [shape: bf16[272,128], index: 2, kind: input, shape index: {}]   ;;  %s565_s3 = inlined_call_operand.vmem [shape: f32[16,128], index: 3, kind: output, shape index: {}]  }
   0x1   :  { %s18_s13 = sshll.u32 %s489_s12, 4  ;;  %s465_s16 = scalar_lea.hbm %s564_s2, 2176  ;;  %s19_s13 = int_to_ptr.vmem [resolvable:$true] %s18_s13 }
   0x2   :  { %p466_p0 = scmp.ne.s32.totalorder %s564_s2, %s465_s16  ;;  %p469_p1 = scmp.lt.u32.totalorder %s465_s16, %s564_s2 }
   0x4   :  { %p471_p2 = pnand %p469_p1, %p466_p0 }
   0x6   :  { %474 = shalt.err (!%p471_p2)
}
   0x7   :  { %s475_s21 = scalar_lea.vmem %s19_s13, 2176  ;;  %p480_p4 = scmp.lt.s32.totalorder %s19_s13, %s19_s13 }
   0x8   :  { %p476_p3 = scmp.ne.s32.totalorder %s19_s13, %s475_s21  ;;  %p481_p5 = scmp.lt.s32.totalorder %s475_s21, %s475_s21 }
   0xa   :  { %p482_p6 = por %p481_p5, %p480_p4 }
   0xc   :  { %p483_p7 = pnand %p482_p6, %p476_p3 }
   0xe   :  { %486 = shalt.err (!%p483_p7)
}
   0xf   :  { %s490_s22 = smov 64   ;;  %s491_s23 = smov 4  }
  0x10   :  { %24 = dma.hbm_to_vmem [thread:$0]  %s564_s2, 2176, %s19_s13, [#allocation3], %s490_s22, %s490_s22, %s491_s23  }
  0x11   :  { %487 = dma.done.wait [#allocation3], 2176  }
  0x12   :  { %488 = vsyncadd [#allocation3], 4294965120  ;;  %v492_v0 = vmov 0.0   ;;  %vm37_vm0 = vcmask 64512   ;;  %v29_v1 = vld [vmem:[%s563_s1] sm:$0xff]  ;;  %v32_v3 = vld [vmem:[%s562_s0 + $0x8] sm:$0xff]  ;;  %v33_v16 = vlaneseq }
  0x13   :  { %396 = vmatprep.subr.bf16.mxu1 %v492_v0  ;;  %v31_v2 = vld [vmem:[%s562_s0] sm:$0xff]  ;;  %391 = vmatprep.subr.mxu0 %v29_v1  ;;  %v441_v4 = vld [vmem:[#allocation2] sm:$0xff]   ;;  %v442_v5 = vld [vmem:[#allocation2 + $0x8] sm:$0xff]   ;;  %vm493_vm1 = vmmov 0  }
  0x14   :  { %393 = vmatprep.mubr.msk.f32.mxu0 %vm37_vm0, %v31_v2  ;;  %392 = vmatpush3.msra.mxu0 %v29_v1  ;;  %v443_v6 = vld [vmem:[#allocation2 + $0x10] sm:$0xff]   ;;  %v444_v7 = vld [vmem:[#allocation2 + $0x18] sm:$0xff]   ;;  %v445_v8 = vld [vmem:[#allocation2 + $0x20] sm:$0xff]   ;;  %v34_v17 = vshrl.u32 %v33_v16, 7 }
  0x15   :  { %394 = vmatmul.mubr.msk.f32.vlgmr.msra.gmra.mrb[0].mxu0 %vm37_vm0, %v32_v3  ;;  %397 = vmatpush3.bf16.msra.mxu1 %v441_v4  ;;  %v446_v9 = vld [vmem:[#allocation2 + $0x28] sm:$0xff]   ;;  %v447_v10 = vld [vmem:[#allocation2 + $0x30] sm:$0xff]   ;;  %v448_v11 = vld [vmem:[#allocation2 + $0x38] sm:$0xff]  }
  0x16   :  { %398 = vmatprep.subr.bf16.mxu1 %v492_v0  ;;  %416 = vmatprep.subr.bf16.mxu0 %v492_v0  ;;  %v449_v12 = vld [vmem:[#allocation2 + $0x40] sm:$0xff]   ;;  %v450_v13 = vld [vmem:[#allocation2 + $0x48] sm:$0xff]   ;;  %v451_v14 = vld [vmem:[#allocation2 + $0x50] sm:$0xff]   ;;  %v35_v18 = vsub.s32 0, %v34_v17  ;;  %v254_v44 = vsub.s32 1, %v34_v17 }
  0x17   :  { %412 = vmatprep.mubr.msk.bf16.mxu1 %vm493_vm1, %v492_v0  ;;  %432 = vmatprep.mubr.msk.bf16.mxu0 %vm493_vm1, %v492_v0  ;;  %v452_v15 = vld [vmem:[#allocation2 + $0x58] sm:$0xff]   ;;  %v453_v28 = vld [vmem:[#allocation2 + $0x60] sm:$0xff]   ;;  %v454_v29 = vld [vmem:[#allocation2 + $0x68] sm:$0xff]  }
  0x18   :  { %417 = vmatpush3.bf16.msra.mxu0 %v449_v12  ;;  %v30_v19 = vld [vmem:[%s563_s1 + $0x8] sm:$0xff]  ;;  %v455_v30 = vld [vmem:[#allocation2 + $0x70] sm:$0xff]   ;;  %v153_v32 = vld [vmem:[#allocation2 + $0x80] sm:$0xf] }
  0x19   :  { %399 = vmatpush3.bf16.msra.mxu1 %v442_v5  ;;  %418 = vmatprep.subr.bf16.mxu0 %v492_v0  ;;  %v36_v20 = vrot.slane %v30_v19, %v35_v18  ;;  %v456_v31 = vld [vmem:[#allocation2 + $0x78] sm:$0xff]   ;;  %v154_v33 = vunpack.c.l.bf16 %v153_v32 }
  0x1a   :  { %400 = vmatprep.subr.bf16.mxu1 %v492_v0 }
  0x1b   :  { %v159_v34 = vrot.slane %v154_v33, %v35_v18  ;;  %v255_v45 = vrot.slane %v154_v33, %v254_v44 }
  0x1c   :  { %419 = vmatpush3.bf16.msra.mxu0 %v450_v13 }
  0x1d   :  { %401 = vmatpush3.bf16.msra.mxu1 %v443_v6  ;;  %420 = vmatprep.subr.bf16.mxu0 %v492_v0 }
  0x1e   :  { %402 = vmatprep.subr.bf16.mxu1 %v492_v0 }
  0x20   :  { %421 = vmatpush3.bf16.msra.mxu0 %v451_v14 }
  0x21   :  { %403 = vmatpush3.bf16.msra.mxu1 %v444_v7  ;;  %422 = vmatprep.subr.bf16.mxu0 %v492_v0 }
  0x22   :  { %404 = vmatprep.subr.bf16.mxu1 %v492_v0 }
  0x24   :  { %423 = vmatpush3.bf16.msra.mxu0 %v452_v15 }
  0x25   :  { %405 = vmatpush3.bf16.msra.mxu1 %v445_v8  ;;  %424 = vmatprep.subr.bf16.mxu0 %v492_v0 }
  0x26   :  { %406 = vmatprep.subr.bf16.mxu1 %v492_v0 }
  0x28   :  { %425 = vmatpush3.bf16.msra.mxu0 %v453_v28 }
  0x29   :  { %407 = vmatpush3.bf16.msra.mxu1 %v446_v9  ;;  %426 = vmatprep.subr.bf16.mxu0 %v492_v0 }
  0x2a   :  { %408 = vmatprep.subr.bf16.mxu1 %v492_v0 }
  0x2c   :  { %427 = vmatpush3.bf16.msra.mxu0 %v454_v29 }
  0x2d   :  { %409 = vmatpush3.bf16.msra.mxu1 %v447_v10  ;;  %428 = vmatprep.subr.bf16.mxu0 %v492_v0 }
  0x2e   :  { %410 = vmatprep.subr.bf16.mxu1 %v492_v0 }
  0x30   :  { %429 = vmatpush3.bf16.msra.mxu0 %v455_v30 }
  0x31   :  { %411 = vmatpush3.bf16.msra.mxu1 %v448_v11  ;;  %430 = vmatprep.subr.bf16.mxu0 %v492_v0 }
  0x34   :  { %431 = vmatpush3.bf16.msra.mxu0 %v456_v31 }
  0xe8   :  { %v395_v21 = vpop.f32.mrb[0].mxu0 }
  0xe9   :  { %v116_v22 = vadd.f32 %v395_v21, %v36_v20  ;;  %v110_v23 = vpop.f32.mrb[1].mxu0 }
  0xea   :  { %v111_v24 = vadd.f32 %v110_v23, %v36_v20 }
  0xeb   :  { %457 = vtanh.f32 %v116_v22 }
  0xec   :  { %459 = vtanh.f32 %v111_v24 }
  0xf5   :  { %v458_v25 = vpop.eup %457 }
  0xf6   :  { %v460_v26 = vpop.eup %459 }
  0xf7   :  { %v155_v27 = vpack.c.bf16 %v458_v25, %v460_v26 }
  0xf9   :  { %413 = vmatmul.mubr.bf16.vlgmr.msra.gmra.mrb[0].mxu1 %v155_v27 }
 0x1cc   :  { %v242_v35 = vpop.f32.mrb[0].mxu1 }
 0x1cd   :  { %v243_v36 = vadd.f32 %v242_v35, %v159_v34  ;;  %v414_v37 = vpop.f32.mrb[1].mxu1 }
 0x1ce   :  { %v245_v38 = vpop.f32.mrb[2].mxu1 }
 0x1cf   :  { %v246_v39 = vadd.f32 %v245_v38, %v159_v34  ;;  %v415_v40 = vpop.f32.mrb[3].mxu1  ;;  %461 = vtanh.f32 %v243_v36 }
 0x1d1   :  { %463 = vtanh.f32 %v246_v39 }
 0x1d9   :  { %v462_v41 = vpop.eup %461 }
 0x1db   :  { %v464_v42 = vpop.eup %463 }
 0x1dc   :  { %v251_v43 = vpack.c.bf16 %v464_v42, %v462_v41 }
 0x1de   :  { %433 = vmatmul.mubr.bf16.vlgmr.msra.gmra.mrb[4].mxu0 %v251_v43 }
 0x2b1   :  { %v338_v46 = vpop.f32.mrb[4].mxu0 }
 0x2b2   :  { %v339_v47 = vadd.f32 %v338_v46, %v255_v45  ;;  %v434_v48 = vpop.f32.mrb[5].mxu0 }
 0x2b3   :  { %v341_v49 = vpop.f32.mrb[6].mxu0 }
 0x2b4   :  { %345 = vst [vmem:[%s565_s3] sm:$0xff] %v339_v47  ;;  %v342_v50 = vadd.f32 %v341_v49, %v255_v45  ;;  %v435_v51 = vpop.f32.mrb[7].mxu0 }
 0x2b6   :  { %346 = vst [vmem:[%s565_s3 + $0x8] sm:$0xff] %v342_v50 }
 0x2b7   :  { %351 = vsyncpa [#allocation3], 1 }

</bundles_post_ra>
